<compile_context>
chip_gen: v7x
topology: tpu7x:2x2x1
jax: 0.10.0
libtpu: 0.0.40
codegen_flags: <defaults>
</compile_context>

<pallas_src>
import jax
import jax.numpy as jnp
import numpy as np
from jax import lax
from jax.experimental import pallas as pl
from jax.experimental.pallas import tpu as pltpu

H = W = 16        # spatial
CIN = 4           # in_channels
F = 8             # filters
K = 3             # conv kernel size
PAD = K // 2      # = 1, 'SAME' padding
EPS = 1e-5
LANES = W * F     # 128: lane width of every kernel operand / output

# TODO(synk): flip to jnp.bfloat16 on v6e/v7x (bf16-native MXU, halves weight +
# activation bytes) and re-validate at ~2e-2 tolerance; f32 keeps the strict
# 1e-3 check below passing and this tiny block is overhead/mem bound anyway.
MATMUL_DTYPE = jnp.float32


def _res_block_kernel(x_ref, w1_ref, w2_ref, p_ref, o_ref):
    """One row-tile (TM = whole images) of the fused block.

    x_ref : (TM, 128)      input, lane-folded NHWC, lanes >= W*CIN are zero
    w1_ref: (K, 128, 128)  banded conv1 weights (BN0 + BN1 scales folded in)
    w2_ref: (K, 128, 128)  banded conv2 weights (BN2 scale folded in)
    p_ref : (3, 128)       row0 = b0/s0 tiled (zero beyond W*CIN lanes),
                           row1/2 = folded conv1/conv2 biases, tiled
    o_ref : (TM, 128)      output, lane-folded NHWC (dense 128-lane store)
    """
    x = x_ref[...]                                        # (TM, 128)
    p = p_ref[...]                                        # (3, 128)
    b0 = p[0:1, :]
    b1 = p[1:2, :]
    b2 = p[2:3, :]

    tm = x.shape[0]
    # Row index within each image; tiles always start at an image boundary.
    hrow = lax.broadcasted_iota(jnp.int32, (tm, 1), 0) % H
    not_top = hrow > 0            # rows that have a row above them in-image
    not_bot = hrow < (H - 1)      # rows that have a row below them in-image

    def conv3x3(y, w_ref):
        # Center tap (kh = 1): no shift, no mask.
        acc = jnp.dot(y.astype(MATMUL_DTYPE), w_ref[1],
                      preferred_element_type=jnp.float32)
        # kh = 0: each output row reads the row above (h-1); zero at h == 0.
        y_above = jnp.where(not_top, pltpu.roll(y, shift=1, axis=0), 0.0)
        acc = acc + jnp.dot(y_above.astype(MATMUL_DTYPE), w_ref[0],
                            preferred_element_type=jnp.float32)
        # kh = 2: each output row reads the row below (h+1); zero at h == H-1.
        y_below = jnp.where(not_bot, pltpu.roll(y, shift=tm - 1, axis=0), 0.0)
        acc = acc + jnp.dot(y_below.astype(MATMUL_DTYPE), w_ref[2],
                            preferred_element_type=jnp.float32)
        return acc                                        # (TM, 128) f32

    # --- F.relu(x) then BatchNorm2d(in_channels); s0 folded into w1 -> 1 add
    y0 = jnp.maximum(x, 0.0) + b0                         # (TM, 128)

    # --- convBlock 1: Conv2d(CIN, F, 3, pad=1) + BN + ReLU
    y1 = jnp.maximum(conv3x3(y0, w1_ref) + b1, 0.0)       # (TM, 128)

    # --- convBlock 2: Conv2d(F, F, 3, pad=1) + BN (no activation)
    y2 = conv3x3(y1, w2_ref) + b2                         # (TM, 128)

    o_ref[...] = y2.astype(o_ref.dtype)                   # dense 128-lane store


def residual_block_forward(x_nhwc, p, max_rows_per_tile=512):
    """x_nhwc: (N, H, W, CIN) float32 -> (N, H, W, F) float32."""
    n = x_nhwc.shape[0]
    rows = n * H

    # Row tiles must hold whole images (multiple of H) so the in-kernel
    # H-shift masks line up with image boundaries, and must divide N evenly.
    imgs_per_tile = max(1, min(n, max_rows_per_tile // H))
    while n % imgs_per_tile:
        imgs_per_tile -= 1
    tm = imgs_per_tile * H
    grid = (rows // tm,)

    x2d = x_nhwc.reshape(rows, W * CIN)                    # layout-preserving
    # Lane-pad 64 -> 128 so conv1's operand is a full, unmasked vreg width.
    x2d = jnp.pad(x2d, ((0, 0), (0, LANES - W * CIN)))

    out2d = pl.pallas_call(
        _res_block_kernel,
        out_shape=jax.ShapeDtypeStruct((rows, LANES), jnp.float32),
        grid=grid,
        in_specs=[
            pl.BlockSpec((tm, LANES), lambda i: (i, 0)),          # streamed rows
            pl.BlockSpec((K, LANES, LANES), lambda i: (0, 0, 0)),  # VMEM-resident
            pl.BlockSpec((K, LANES, LANES), lambda i: (0, 0, 0)),  # VMEM-resident
            pl.BlockSpec((3, LANES), lambda i: (0, 0)),            # VMEM-resident
        ],
        out_specs=pl.BlockSpec((tm, LANES), lambda i: (i, 0)),
        compiler_params=pltpu.CompilerParams(
            dimension_semantics=("parallel",)),            # rows are independent
    )(x2d, p["w1b"], p["w2b"], p["pvec"])
    return out2d.reshape(n, H, W, F)                       # layout-preserving


def _band_weight(w_hwio, scale_out, scale_in=None, lanes_in=None):
    """(K, K, Ci, Co) HWIO conv weight -> (K, lanes_in, W*Co) banded weight.

    For each kh, row (wq, c) pairs with lane wq*Ci+c of the kh-shifted input
    rows; column (w, f) is output pixel column w, output channel f.
    Out-of-range W taps have no entry -> 'SAME' zero padding along W.
    BN output scale (and optionally the input-channel scale) are folded in.
    Rows beyond W*Ci (lane padding) are zero.
    """
    ws = (np.asarray(w_hwio, np.float32)
          * np.asarray(scale_out, np.float32)[None, None, None, :])
    if scale_in is not None:
        ws = ws * np.asarray(scale_in, np.float32)[None, None, :, None]
    ci, co = ws.shape[2], ws.shape[3]
    if lanes_in is None:
        lanes_in = W * ci
    mat = np.zeros((K, W, ci, W, co), np.float32)
    for kh in range(K):
        for kw in range(K):
            for w in range(W):
                wq = w + kw - PAD
                if 0 <= wq < W:
                    mat[kh, wq, :, w, :] += ws[kh, kw]
    mat = mat.reshape(K, W * ci, W * co)
    if lanes_in > W * ci:
        mat = np.concatenate(
            [mat, np.zeros((K, lanes_in - W * ci, W * co), np.float32)], axis=1)
    return jnp.asarray(mat, dtype=MATMUL_DTYPE)


def make_params(key):
    """Deterministic synthetic parameters (PyTorch __init__ shapes), in HWIO."""
    ks = jax.random.split(key, 16)

    # residualBlock.norm = BatchNorm2d(CIN)
    g0 = 1.0 + 0.1 * jax.random.normal(ks[0], (CIN,), jnp.float32)
    be0 = 0.1 * jax.random.normal(ks[1], (CIN,), jnp.float32)
    rm0 = 0.1 * jax.random.normal(ks[2], (CIN,), jnp.float32)
    rv0 = jax.random.uniform(ks[3], (CIN,), jnp.float32, 0.5, 1.5)

    # conv1: Conv2d(CIN, F, 3, pad=1) + BatchNorm2d(F)
    w1 = 0.2 * jax.random.normal(ks[4], (K, K, CIN, F), jnp.float32)   # HWIO
    cb1 = 0.1 * jax.random.normal(ks[5], (F,), jnp.float32)
    g1 = 1.0 + 0.1 * jax.random.normal(ks[6], (F,), jnp.float32)
    be1 = 0.1 * jax.random.normal(ks[7], (F,), jnp.float32)
    rm1 = 0.1 * jax.random.normal(ks[8], (F,), jnp.float32)
    rv1 = jax.random.uniform(ks[9], (F,), jnp.float32, 0.5, 1.5)

    # conv2: Conv2d(F, F, 3, pad=1) + BatchNorm2d(F)
    w2 = 0.2 * jax.random.normal(ks[10], (K, K, F, F), jnp.float32)    # HWIO
    cb2 = 0.1 * jax.random.normal(ks[11], (F,), jnp.float32)
    g2 = 1.0 + 0.1 * jax.random.normal(ks[12], (F,), jnp.float32)
    be2 = 0.1 * jax.random.normal(ks[13], (F,), jnp.float32)
    rm2 = 0.1 * jax.random.normal(ks[14], (F,), jnp.float32)
    rv2 = jax.random.uniform(ks[15], (F,), jnp.float32, 0.5, 1.5)

    raw = dict(g0=g0, be0=be0, rm0=rm0, rv0=rv0,
               w1=w1, cb1=cb1, g1=g1, be1=be1, rm1=rm1, rv1=rv1,
               w2=w2, cb2=cb2, g2=g2, be2=be2, rm2=rm2, rv2=rv2)

    # Fold eval-mode BatchNorm (+ conv bias) into per-channel scale / bias.
    s0 = g0 / jnp.sqrt(rv0 + EPS)
    b0 = be0 - rm0 * s0
    b0p = b0 / s0                       # s0 is folded into w1b, so y0 = relu(x) + b0p
    s1 = g1 / jnp.sqrt(rv1 + EPS)
    b1 = (cb1 - rm1) * s1 + be1
    s2 = g2 / jnp.sqrt(rv2 + EPS)
    b2 = (cb2 - rm2) * s2 + be2

    lane_pad = jnp.zeros((LANES - W * CIN,), jnp.float32)
    pvec = jnp.stack([
        jnp.concatenate([jnp.tile(b0p, W), lane_pad]),   # (128,) padded lanes stay 0
        jnp.tile(b1, W),                                 # (128,) conv1 bias, folded
        jnp.tile(b2, W),                                 # (128,) conv2 bias, folded
    ])                                                   # (3, 128)

    folded = dict(
        w1b=_band_weight(w1, s1, scale_in=s0, lanes_in=LANES),   # (3, 128, 128)
        w2b=_band_weight(w2, s2),                                # (3, 128, 128)
        pvec=pvec,
    )
    return raw, folded


def reference_forward(x, r):
    """Pure-JAX NHWC reference matching the PyTorch forward (eval-mode BN)."""
    def bn(y, g, be, rm, rv):
        return (y - rm) / jnp.sqrt(rv + EPS) * g + be

    def conv(y, w, b):
        out = lax.conv_general_dilated(
            y, w, (1, 1), "SAME",
            dimension_numbers=("NHWC", "HWIO", "NHWC"),
            precision=lax.Precision.HIGHEST)
        return out + b

    y = jax.nn.relu(x)
    y = bn(y, r["g0"], r["be0"], r["rm0"], r["rv0"])
    y = jax.nn.relu(bn(conv(y, r["w1"], r["cb1"]),
                       r["g1"], r["be1"], r["rm1"], r["rv1"]))
    y = bn(conv(y, r["w2"], r["cb2"]),
           r["g2"], r["be2"], r["rm2"], r["rv2"])
    return y


if __name__ == "__main__":
    key = jax.random.PRNGKey(0)
    kx, kp = jax.random.split(key)

    # Equivalent PyTorch input: (2, 4, 16, 16) NCHW -> here (2, 16, 16, 4) NHWC.
    x = jax.random.normal(kx, (2, H, W, CIN), jnp.float32)
    raw, folded = make_params(kp)

    out = residual_block_forward(x, folded)
    out = jax.block_until_ready(out)

    ref = reference_forward(x, raw)
    assert out.shape == (2, H, W, F), out.shape
    tol = 1e-3 if MATMUL_DTYPE == jnp.float32 else 2e-2
    max_err = float(jnp.max(jnp.abs(out - ref)))
    if not bool(jnp.allclose(out, ref, atol=tol, rtol=tol)):
        raise AssertionError(f"Pallas kernel mismatch vs reference (max abs err {max_err})")

    print("KERNEL_OK")
</pallas_src>

<mosaic_0001>
module attributes {stable_mosaic.version = 11 : i64} {
  func.func @_res_block_kernel(%arg0: i32, %arg1: memref<32x128xf32, #tpu.memory_space<vmem>>, %arg2: memref<3x128x128xf32, #tpu.memory_space<vmem>>, %arg3: memref<3x128x128xf32, #tpu.memory_space<vmem>>, %arg4: memref<3x128xf32, #tpu.memory_space<vmem>>, %arg5: memref<32x128xf32, #tpu.memory_space<vmem>>) attributes {dimension_semantics = [#tpu.dimension_semantics<parallel>], iteration_bounds = array<i64: 1>, scalar_prefetch = 0 : i64, scratch_operands = 0 : i64, tpu.core_type = #tpu.core_type<tc>, window_params = [{transform_indices = @transform_0, window_bounds = array<i64: 32, 128>}, {pipeline_mode = #tpu.pipeline_mode<synchronous>, transform_indices = @transform_1, window_bounds = array<i64: 3, 128, 128>}, {pipeline_mode = #tpu.pipeline_mode<synchronous>, transform_indices = @transform_2, window_bounds = array<i64: 3, 128, 128>}, {pipeline_mode = #tpu.pipeline_mode<synchronous>, transform_indices = @transform_3, window_bounds = array<i64: 3, 128>}, {transform_indices = @transform_4, window_bounds = array<i64: 32, 128>}]} {
    %c0 = arith.constant 0 : index
    %c0_0 = arith.constant 0 : index
    %0 = vector.load %arg1[%c0, %c0_0] : memref<32x128xf32, #tpu.memory_space<vmem>>, vector<32x128xf32>
    %c0_1 = arith.constant 0 : index
    %c0_2 = arith.constant 0 : index
    %1 = vector.load %arg4[%c0_1, %c0_2] : memref<3x128xf32, #tpu.memory_space<vmem>>, vector<3x128xf32>
    %2 = vector.extract_strided_slice %1 {offsets = [0, 0], sizes = [1, 128], strides = [1, 1]} : vector<3x128xf32> to vector<1x128xf32>
    %3 = vector.extract_strided_slice %1 {offsets = [1, 0], sizes = [1, 128], strides = [1, 1]} : vector<3x128xf32> to vector<1x128xf32>
    %4 = vector.extract_strided_slice %1 {offsets = [2, 0], sizes = [1, 128], strides = [1, 1]} : vector<3x128xf32> to vector<1x128xf32>
    %5 = tpu.iota {dimensions = array<i32: 0>} : vector<32x1xi32>
    %c16_i32 = arith.constant 16 : i32
    %c0_i32 = arith.constant 0 : i32
    %6 = arith.cmpi eq, %c16_i32, %c0_i32 : i32
    %c1_i32 = arith.constant 1 : i32
    %7 = arith.select %6, %c1_i32, %c16_i32 : i32
    %8 = vector.broadcast %7 : i32 to vector<32x1xi32>
    %9 = arith.remsi %5, %8 : vector<32x1xi32>
    %c0_i32_3 = arith.constant 0 : i32
    %10 = vector.broadcast %c0_i32_3 : i32 to vector<32x1xi32>
    %11 = arith.cmpi ne, %9, %10 : vector<32x1xi32>
    %c0_i32_4 = arith.constant 0 : i32
    %12 = vector.broadcast %c0_i32_4 : i32 to vector<32x1xi32>
    %13 = arith.cmpi slt, %9, %12 : vector<32x1xi32>
    %c0_i32_5 = arith.constant 0 : i32
    %14 = arith.cmpi slt, %7, %c0_i32_5 : i32
    %15 = vector.broadcast %14 : i1 to vector<32x1xi1>
    %16 = vector.broadcast %15 : vector<32x1xi1> to vector<32x1xi1>
    %17 = arith.xori %13, %16 : vector<32x1xi1>
    %18 = arith.andi %17, %11 : vector<32x1xi1>
    %19 = vector.broadcast %7 : i32 to vector<32x1xi32>
    %20 = arith.addi %9, %19 : vector<32x1xi32>
    %21 = arith.select %18, %20, %9 : vector<32x1xi1>, vector<32x1xi32>
    %c0_i32_6 = arith.constant 0 : i32
    %22 = vector.broadcast %c0_i32_6 : i32 to vector<32x1xi32>
    %23 = arith.cmpi sgt, %21, %22 : vector<32x1xi32>
    %c15_i32 = arith.constant 15 : i32
    %24 = vector.broadcast %c15_i32 : i32 to vector<32x1xi32>
    %25 = arith.cmpi slt, %21, %24 : vector<32x1xi32>
    %cst = arith.constant 0.000000e+00 : f32
    %26 = vector.broadcast %cst : f32 to vector<32x128xf32>
    %27 = arith.maximumf %0, %26 : vector<32x128xf32>
    %28 = vector.broadcast %2 : vector<1x128xf32> to vector<32x128xf32>
    %29 = arith.addf %27, %28 : vector<32x128xf32>
    %c1 = arith.constant 1 : index
    %c0_7 = arith.constant 0 : index
    %c0_8 = arith.constant 0 : index
    %30 = vector.load %arg2[%c1, %c0_7, %c0_8] : memref<3x128x128xf32, #tpu.memory_space<vmem>>, vector<1x128x128xf32>
    %31 = vector.shape_cast %30 : vector<1x128x128xf32> to vector<128x128xf32>
    %cst_9 = arith.constant dense<0.000000e+00> : vector<32x128xf32>
    %32 = tpu.matmul %29, %31, %cst_9 {dimension_numbers = #tpu.dot_dimension_numbers<[1], [0], [0], [1], [0, 0, 1, 1], [], []>} : vector<32x128xf32>, vector<128x128xf32>, vector<32x128xf32> -> vector<32x128xf32>
    %c1_i32_10 = arith.constant 1 : i32
    %33 = tpu.dynamic_rotate %29 by %c1_i32_10 dim 0 : vector<32x128xf32>, i32 -> vector<32x128xf32>
    %cst_11 = arith.constant 0.000000e+00 : f32
    %34 = vector.shape_cast %23 : vector<32x1xi1> to vector<32x1xi1>
    %35 = vector.broadcast %34 : vector<32x1xi1> to vector<32x128xi1>
    %36 = vector.broadcast %cst_11 : f32 to vector<32x128xf32>
    %37 = arith.select %35, %33, %36 : vector<32x128xi1>, vector<32x128xf32>
    %c0_12 = arith.constant 0 : index
    %c0_13 = arith.constant 0 : index
    %c0_14 = arith.constant 0 : index
    %38 = vector.load %arg2[%c0_12, %c0_13, %c0_14] : memref<3x128x128xf32, #tpu.memory_space<vmem>>, vector<1x128x128xf32>
    %39 = vector.shape_cast %38 : vector<1x128x128xf32> to vector<128x128xf32>
    %cst_15 = arith.constant dense<0.000000e+00> : vector<32x128xf32>
    %40 = tpu.matmul %37, %39, %cst_15 {dimension_numbers = #tpu.dot_dimension_numbers<[1], [0], [0], [1], [0, 0, 1, 1], [], []>} : vector<32x128xf32>, vector<128x128xf32>, vector<32x128xf32> -> vector<32x128xf32>
    %41 = arith.addf %32, %40 : vector<32x128xf32>
    %c31_i32 = arith.constant 31 : i32
    %42 = tpu.dynamic_rotate %29 by %c31_i32 dim 0 : vector<32x128xf32>, i32 -> vector<32x128xf32>
    %cst_16 = arith.constant 0.000000e+00 : f32
    %43 = vector.shape_cast %25 : vector<32x1xi1> to vector<32x1xi1>
    %44 = vector.broadcast %43 : vector<32x1xi1> to vector<32x128xi1>
    %45 = vector.broadcast %cst_16 : f32 to vector<32x128xf32>
    %46 = arith.select %44, %42, %45 : vector<32x128xi1>, vector<32x128xf32>
    %c2 = arith.constant 2 : index
    %c0_17 = arith.constant 0 : index
    %c0_18 = arith.constant 0 : index
    %47 = vector.load %arg2[%c2, %c0_17, %c0_18] : memref<3x128x128xf32, #tpu.memory_space<vmem>>, vector<1x128x128xf32>
    %48 = vector.shape_cast %47 : vector<1x128x128xf32> to vector<128x128xf32>
    %cst_19 = arith.constant dense<0.000000e+00> : vector<32x128xf32>
    %49 = tpu.matmul %46, %48, %cst_19 {dimension_numbers = #tpu.dot_dimension_numbers<[1], [0], [0], [1], [0, 0, 1, 1], [], []>} : vector<32x128xf32>, vector<128x128xf32>, vector<32x128xf32> -> vector<32x128xf32>
    %50 = arith.addf %41, %49 : vector<32x128xf32>
    %51 = vector.broadcast %3 : vector<1x128xf32> to vector<32x128xf32>
    %52 = arith.addf %50, %51 : vector<32x128xf32>
    %cst_20 = arith.constant 0.000000e+00 : f32
    %53 = vector.broadcast %cst_20 : f32 to vector<32x128xf32>
    %54 = arith.maximumf %52, %53 : vector<32x128xf32>
    %c1_21 = arith.constant 1 : index
    %c0_22 = arith.constant 0 : index
    %c0_23 = arith.constant 0 : index
    %55 = vector.load %arg3[%c1_21, %c0_22, %c0_23] : memref<3x128x128xf32, #tpu.memory_space<vmem>>, vector<1x128x128xf32>
    %56 = vector.shape_cast %55 : vector<1x128x128xf32> to vector<128x128xf32>
    %cst_24 = arith.constant dense<0.000000e+00> : vector<32x128xf32>
    %57 = tpu.matmul %54, %56, %cst_24 {dimension_numbers = #tpu.dot_dimension_numbers<[1], [0], [0], [1], [0, 0, 1, 1], [], []>} : vector<32x128xf32>, vector<128x128xf32>, vector<32x128xf32> -> vector<32x128xf32>
    %c1_i32_25 = arith.constant 1 : i32
    %58 = tpu.dynamic_rotate %54 by %c1_i32_25 dim 0 : vector<32x128xf32>, i32 -> vector<32x128xf32>
    %cst_26 = arith.constant 0.000000e+00 : f32
    %59 = vector.shape_cast %23 : vector<32x1xi1> to vector<32x1xi1>
    %60 = vector.broadcast %59 : vector<32x1xi1> to vector<32x128xi1>
    %61 = vector.broadcast %cst_26 : f32 to vector<32x128xf32>
    %62 = arith.select %60, %58, %61 : vector<32x128xi1>, vector<32x128xf32>
    %c0_27 = arith.constant 0 : index
    %c0_28 = arith.constant 0 : index
    %c0_29 = arith.constant 0 : index
    %63 = vector.load %arg3[%c0_27, %c0_28, %c0_29] : memref<3x128x128xf32, #tpu.memory_space<vmem>>, vector<1x128x128xf32>
    %64 = vector.shape_cast %63 : vector<1x128x128xf32> to vector<128x128xf32>
    %cst_30 = arith.constant dense<0.000000e+00> : vector<32x128xf32>
    %65 = tpu.matmul %62, %64, %cst_30 {dimension_numbers = #tpu.dot_dimension_numbers<[1], [0], [0], [1], [0, 0, 1, 1], [], []>} : vector<32x128xf32>, vector<128x128xf32>, vector<32x128xf32> -> vector<32x128xf32>
    %66 = arith.addf %57, %65 : vector<32x128xf32>
    %c31_i32_31 = arith.constant 31 : i32
    %67 = tpu.dynamic_rotate %54 by %c31_i32_31 dim 0 : vector<32x128xf32>, i32 -> vector<32x128xf32>
    %cst_32 = arith.constant 0.000000e+00 : f32
    %68 = vector.shape_cast %25 : vector<32x1xi1> to vector<32x1xi1>
    %69 = vector.broadcast %68 : vector<32x1xi1> to vector<32x128xi1>
    %70 = vector.broadcast %cst_32 : f32 to vector<32x128xf32>
    %71 = arith.select %69, %67, %70 : vector<32x128xi1>, vector<32x128xf32>
    %c2_33 = arith.constant 2 : index
    %c0_34 = arith.constant 0 : index
    %c0_35 = arith.constant 0 : index
    %72 = vector.load %arg3[%c2_33, %c0_34, %c0_35] : memref<3x128x128xf32, #tpu.memory_space<vmem>>, vector<1x128x128xf32>
    %73 = vector.shape_cast %72 : vector<1x128x128xf32> to vector<128x128xf32>
    %cst_36 = arith.constant dense<0.000000e+00> : vector<32x128xf32>
    %74 = tpu.matmul %71, %73, %cst_36 {dimension_numbers = #tpu.dot_dimension_numbers<[1], [0], [0], [1], [0, 0, 1, 1], [], []>} : vector<32x128xf32>, vector<128x128xf32>, vector<32x128xf32> -> vector<32x128xf32>
    %75 = arith.addf %66, %74 : vector<32x128xf32>
    %76 = vector.broadcast %4 : vector<1x128xf32> to vector<32x128xf32>
    %77 = arith.addf %75, %76 : vector<32x128xf32>
    %c0_37 = arith.constant 0 : index
    %c0_38 = arith.constant 0 : index
    %78 = vector.load %arg5[%c0_37, %c0_38] : memref<32x128xf32, #tpu.memory_space<vmem>>, vector<32x128xf32>
    tpu.vector_store %arg5[%c0_37, %c0_38], %77 {strides = array<i32>} : memref<32x128xf32, #tpu.memory_space<vmem>>, vector<32x128xf32>,
    return
  }
  func.func @transform_0(%arg0: i32) -> (i32, i32) {
    %c0_i32 = arith.constant 0 : i32
    %c0_i32_0 = arith.constant 0 : i32
    return %arg0, %c0_i32 : i32, i32
  }
  func.func @transform_1(%arg0: i32) -> (i32, i32, i32) {
    %c0_i32 = arith.constant 0 : i32
    %c0_i32_0 = arith.constant 0 : i32
    %c0_i32_1 = arith.constant 0 : i32
    %c0_i32_2 = arith.constant 0 : i32
    return %c0_i32, %c0_i32_0, %c0_i32_1 : i32, i32, i32
  }
  func.func @transform_2(%arg0: i32) -> (i32, i32, i32) {
    %c0_i32 = arith.constant 0 : i32
    %c0_i32_0 = arith.constant 0 : i32
    %c0_i32_1 = arith.constant 0 : i32
    %c0_i32_2 = arith.constant 0 : i32
    return %c0_i32, %c0_i32_0, %c0_i32_1 : i32, i32, i32
  }
  func.func @transform_3(%arg0: i32) -> (i32, i32) {
    %c0_i32 = arith.constant 0 : i32
    %c0_i32_0 = arith.constant 0 : i32
    %c0_i32_1 = arith.constant 0 : i32
    return %c0_i32, %c0_i32_0 : i32, i32
  }
  func.func @transform_4(%arg0: i32) -> (i32, i32) {
    %c0_i32 = arith.constant 0 : i32
    %c0_i32_0 = arith.constant 0 : i32
    return %arg0, %c0_i32 : i32, i32
  }
}

</mosaic_0001>

<bundles_post_ra>
// kernel: tpu_custom_call.1
= control target key start
LH: loop header
LB: loop body
LE: loop exit
PB: predicated region body
PF: predicated region fallthrough
CT: control target
= control target key end

     0   :  { %9 = vsyncpa [#allocation3], 0  ;;  %s1774_s0 = inlined_call_operand.hbm [shape: f32[32,128], index: 0, kind: input, shape index: {}]   ;;  %s1775_s1 = inlined_call_operand.hbm [shape: f32[3,128,128], index: 1, kind: input, shape index: {}]   ;;  %s1776_s2 = inlined_call_operand.hbm [shape: f32[3,128,128], index: 2, kind: input, shape index: {}]   ;;  %s1777_s3 = inlined_call_operand.vmem [shape: f32[3,128], index: 3, kind: input, shape index: {}]   ;;  %s1778_s4 = inlined_call_operand.hbm [shape: f32[32,128], index: 4, kind: output, shape index: {}]  }
   0x1   :  { %10 = vsyncpa [#allocation6], 0 }
   0x2   :  { %11 = vsyncpa [#allocation4], 0  ;;  %s1527_s15 = smov [#allocation5]   ;;  %s1528_s17 = smov [#allocation2]  }
   0x3   :  { %s29_s16 = sshll.u32 %s1527_s15, 4  ;;  %s17_s18 = sshll.u32 %s1528_s17, 4  ;;  %s30_s16 = int_to_ptr.vmem [resolvable:$true] %s29_s16  ;;  %s1558_s18 = int_to_ptr.vmem [resolvable:$true] %s17_s18 }
   0x4   :  { %s1433_s21 = scalar_lea.hbm %s1775_s1, 6144 }
   0x5   :  { %p1434_p0 = scmp.ne.s32.totalorder %s1775_s1, %s1433_s21  ;;  %p1437_p1 = scmp.lt.u32.totalorder %s1433_s21, %s1775_s1 }
   0x7   :  { %p1439_p2 = pnand %p1437_p1, %p1434_p0 }
   0x9   :  { %1442 = shalt.err (!%p1439_p2)
}
   0xa   :  { %s1443_s26 = scalar_lea.vmem %s30_s16, 6144  ;;  %p1448_p4 = scmp.lt.s32.totalorder %s30_s16, %s30_s16 }
   0xb   :  { %p1444_p3 = scmp.ne.s32.totalorder %s30_s16, %s1443_s26  ;;  %p1449_p5 = scmp.lt.s32.totalorder %s1443_s26, %s1443_s26 }
   0xd   :  { %p1450_p6 = por %p1449_p5, %p1448_p4 }
   0xf   :  { %p1451_p7 = pnand %p1450_p6, %p1444_p3 }
  0x11   :  { %1454 = shalt.err (!%p1451_p7)
}
  0x12   :  { %s1529_s27 = smov 128   ;;  %s1530_s28 = smov 8  }
  0x13   :  { %35 = dma.hbm_to_vmem [thread:$0]  %s1775_s1, 6144, %s30_s16, [#allocation6], %s1529_s27, %s1529_s27, %s1530_s28  }
  0x14   :  { %s1455_s7 = scalar_lea.hbm %s1774_s0, 512 }
  0x15   :  { %p1456_p8 = scmp.ne.s32.totalorder %s1774_s0, %s1455_s7  ;;  %p1459_p9 = scmp.lt.u32.totalorder %s1455_s7, %s1774_s0 }
  0x17   :  { %p1461_p10 = pnand %p1459_p9, %p1456_p8 }
  0x19   :  { %1464 = shalt.err (!%p1461_p10)
}
  0x1a   :  { %s1465_s12 = scalar_lea.vmem %s1558_s18, 512  ;;  %p1470_p12 = scmp.lt.s32.totalorder %s1558_s18, %s1558_s18 }
  0x1b   :  { %p1466_p11 = scmp.ne.s32.totalorder %s1558_s18, %s1465_s12  ;;  %p1471_p13 = scmp.lt.s32.totalorder %s1465_s12, %s1465_s12 }
  0x1d   :  { %p1472_p0 = por %p1471_p13, %p1470_p12 }
  0x1f   :  { %p1473_p1 = pnand %p1472_p0, %p1466_p11 }
  0x21   :  { %1476 = shalt.err (!%p1473_p1)
}
  0x22   :  { %23 = dma.hbm_to_vmem [thread:$0]  %s1774_s0, 512, %s1558_s18, [#allocation3], %s1529_s27, %s1529_s27, %s1530_s28  }
  0x23   :  { %s1531_s14 = smov [#allocation7]   ;;  %s1477_s19 = scalar_lea.hbm %s1776_s2, 6144 }
  0x24   :  { %s41_s15 = sshll.u32 %s1531_s14, 4  ;;  %p1478_p2 = scmp.ne.s32.totalorder %s1776_s2, %s1477_s19  ;;  %s42_s15 = int_to_ptr.vmem [resolvable:$true] %s41_s15 }
  0x25   :  { %p1481_p3 = scmp.lt.u32.totalorder %s1477_s19, %s1776_s2 }
  0x27   :  { %p1483_p4 = pnand %p1481_p3, %p1478_p2 }
  0x29   :  { %1486 = shalt.err (!%p1483_p4)
}
  0x2a   :  { %s1487_s24 = scalar_lea.vmem %s42_s15, 6144  ;;  %p1492_p6 = scmp.lt.s32.totalorder %s42_s15, %s42_s15 }
  0x2b   :  { %p1488_p5 = scmp.ne.s32.totalorder %s42_s15, %s1487_s24  ;;  %p1493_p7 = scmp.lt.s32.totalorder %s1487_s24, %s1487_s24 }
  0x2d   :  { %p1494_p8 = por %p1493_p7, %p1492_p6 }
  0x2f   :  { %p1495_p9 = pnand %p1494_p8, %p1488_p5 }
  0x31   :  { %1498 = shalt.err (!%p1495_p9)
}
  0x32   :  { %47 = dma.hbm_to_vmem [thread:$0]  %s1776_s2, 6144, %s42_s15, [#allocation6], %s1529_s27, %s1529_s27, %s1530_s28  }
  0x33   :  { %1521 = dma.done.wait [#allocation3], 512  }
  0x34   :  { %1522 = vsyncadd [#allocation3], 4294966784 }
  0x35   :  { %1523 = dma.done.wait [#allocation6], 12288  }
  0x36   :  { %1524 = vsyncadd [#allocation6], 4294955008  ;;  %v64_v0 = vlaneseq  ;;  %v175_v2 = vld [vmem:[#allocation5] sm:$0xff]  ;;  %v176_v3 = vld [vmem:[#allocation5 + $0x8] sm:$0xff] }
  0x37   :  { %v177_v4 = vld [vmem:[#allocation5 + $0x10] sm:$0xff]  ;;  %v1219_v5 = vpack.c.bf16 %v176_v3, %v175_v2  ;;  %v178_v6 = vld [vmem:[#allocation5 + $0x18] sm:$0xff]  ;;  %v179_v8 = vld [vmem:[#allocation5 + $0x20] sm:$0xff] }
  0x38   :  { %v1610_v1 = vshrl.u32 %v64_v0, 7  ;;  %v1223_v7 = vpack.c.bf16 %v178_v6, %v177_v4  ;;  %v180_v9 = vld [vmem:[#allocation5 + $0x28] sm:$0xff]  ;;  %v59_v12 = vld [vmem:[#allocation2] sm:$0xff]  ;;  %v62_v13 = vld [vmem:[#allocation2 + $0x18] sm:$0xff] }
  0x39   :  { %1220 = vmatprep.subr.bf16.mxu0 %v1219_v5  ;;  %v1227_v11 = vpack.c.bf16 %v180_v9, %v179_v8  ;;  %v181_v14 = vld [vmem:[#allocation5 + $0x30] sm:$0xff]  ;;  %v182_v15 = vld [vmem:[#allocation5 + $0x38] sm:$0xff]  ;;  %v1616_v16 = vld [vmem:[%s1777_s3] sm:$0x7]  ;;  %v125_v17 = vmax.f32 %v59_v12, 0.0  ;;  %v128_v18 = vmax.f32 %v62_v13, 0.0 }
  0x3a   :  { %v131_v10 = vsub.s32 0, %v1610_v1  ;;  %1222 = vmatpush3.bf16.msra.mxu0 %v1219_v5  ;;  %v73_v19 = vand.u32 15, %v1610_v1  ;;  %v1231_v21 = vpack.c.bf16 %v182_v15, %v181_v14  ;;  %v183_v24 = vld [vmem:[#allocation5 + $0x40] sm:$0xff]  ;;  %v184_v25 = vld [vmem:[#allocation5 + $0x48] sm:$0xff]  ;;  %vm158_vm0 = vcmp.lt.s32.totalorder %v1610_v1, 1  ;;  %v61_v29 = vld [vmem:[#allocation2 + $0x10] sm:$0xff] }
  0x3b   :  { %1224 = vmatprep.subr.bf16.mxu0 %v1223_v7  ;;  %v127_v30 = vmax.f32 %v61_v29, 0.0  ;;  %v1235_v31 = vpack.c.bf16 %v184_v25, %v183_v24  ;;  %v185_v33 = vld [vmem:[#allocation5 + $0x50] sm:$0xff]  ;;  %v186_v34 = vld [vmem:[#allocation5 + $0x58] sm:$0xff]  ;;  %v187_v37 = vld [vmem:[#allocation5 + $0x60] sm:$0xff]  ;;  %vm365_vm2 = vcmp.lt.s32.totalorder %v1610_v1, 7  ;;  %v67_v60 = vadd.s32 16, %v1610_v1 }
  0x3c   :  { %v132_v20 = vrot.slane %v1616_v16, %v131_v10  ;;  %vm1625_vm1 = vcmp.gt.s32.totalorder %v73_v19, 0  ;;  %v1239_v38 = vpack.c.bf16 %v186_v34, %v185_v33  ;;  %v188_v39 = vld [vmem:[#allocation5 + $0x68] sm:$0xff]  ;;  %v529_v42 = vld [vmem:[#allocation7] sm:$0xff]  ;;  %v531_v44 = vld [vmem:[#allocation7 + $0x10] sm:$0xff]  ;;  %s1532_s3 = smov [#allocation8]  }
  0x3d   :  { %v60_v40 = vld [vmem:[#allocation2 + $0x8] sm:$0xff]  ;;  %v532_v45 = vld [vmem:[#allocation7 + $0x18] sm:$0xff]  ;;  %v533_v50 = vld [vmem:[#allocation7 + $0x20] sm:$0xff]  ;;  %v1243_v52 = vpack.c.bf16 %v188_v39, %v187_v37  ;;  %v87_v5 = vand.u32 15, %v67_v60  ;;  %s850_s26 = sshll.u32 %s1532_s3, 4  ;;  %s851_s26 = int_to_ptr.vmem [resolvable:$true] %s850_s26 }
  0x3e   :  { %1226 = vmatpush3.bf16.msra.mxu0 %v1223_v7  ;;  %v1620_v22 = vadd.f32 %v132_v20, %v125_v17  ;;  %v1622_v23 = vadd.f32 %v132_v20, %v128_v18  ;;  %v1639_v35 = vadd.f32 %v132_v20, %v127_v30  ;;  %v530_v43 = vld [vmem:[#allocation7 + $0x8] sm:$0xff]  ;;  %v1319_v48 = vpack.c.bf16 %v532_v45, %v531_v44  ;;  %v189_v53 = vld [vmem:[#allocation5 + $0x70] sm:$0xff]  ;;  %v190_v54 = vld [vmem:[#allocation5 + $0x78] sm:$0xff]  ;;  %s1499_s29 = scalar_lea.vmem %s851_s26, 512  ;;  %p1504_p11 = scmp.lt.s32.totalorder %s851_s26, %s851_s26 }
  0x3f   :  { %1228 = vmatprep.subr.bf16.mxu0 %v1227_v11  ;;  %v1315_v47 = vpack.c.bf16 %v530_v43, %v529_v42  ;;  %v126_v49 = vmax.f32 %v60_v40, 0.0  ;;  %v534_v51 = vld [vmem:[#allocation7 + $0x28] sm:$0xff]  ;;  %v535_v57 = vld [vmem:[#allocation7 + $0x30] sm:$0xff]  ;;  %v536_v58 = vld [vmem:[#allocation7 + $0x38] sm:$0xff]  ;;  %v1247_v59 = vpack.c.bf16 %v190_v54, %v189_v53  ;;  %vm1661_vm3 = vcmp.gt.s32.totalorder %v87_v5, 0  ;;  %p1500_p10 = scmp.ne.s32.totalorder %s851_s26, %s1499_s29  ;;  %p1505_p12 = scmp.lt.s32.totalorder %s1499_s29, %s1499_s29 }
  0x40   :  { %v154_v27 = vrot.slane %v1620_v22, 7  ;;  %v157_v28 = vrot.slane %v1622_v23, 7  ;;  %v364_v36 = vrot.slane %v1622_v23, 1  ;;  %v363_v41 = vrot.slane %v1639_v35, 1  ;;  %v138_v61 = vld [vmem:[#allocation5 + $0x80] sm:$0xff]  ;;  %v139_v62 = vld [vmem:[#allocation5 + $0x88] sm:$0xff] }
  0x41   :  { %1316 = vmatprep.subr.bf16.mxu1 %v1315_v47  ;;  %v1323_v55 = vpack.c.bf16 %v534_v51, %v533_v50  ;;  %v1652_v56 = vadd.f32 %v132_v20, %v126_v49  ;;  %v1327_v63 = vpack.c.bf16 %v536_v58, %v535_v57  ;;  %v537_v2 = vld [vmem:[#allocation7 + $0x40] sm:$0xff]  ;;  %v538_v3 = vld [vmem:[#allocation7 + $0x48] sm:$0xff]  ;;  %v1251_v4 = vpack.c.bf16 %v139_v62, %v138_v61  ;;  %v140_v7 = vld [vmem:[#allocation5 + $0x90] sm:$0xff]  ;;  %p1506_p13 = por %p1505_p12, %p1504_p11 }
  0x42   :  { %1230 = vmatpush3.bf16.msra.mxu0 %v1227_v11  ;;  %v162_v32 = vsel %vm158_vm0, %v157_v28, %v154_v27  ;;  %v1650_v46 = vsel %vm365_vm2, %v363_v41, %v364_v36  ;;  %1318 = vmatpush3.bf16.msra.mxu1 %v1315_v47  ;;  %v156_v6 = vrot.slane %v1639_v35, 7  ;;  %v141_v8 = vld [vmem:[#allocation5 + $0x98] sm:$0xff]  ;;  %v1331_v9 = vpack.c.bf16 %v538_v3, %v537_v2  ;;  %v142_v14 = vld [vmem:[#allocation5 + $0xa0] sm:$0xff]  ;;  %v143_v15 = vld [vmem:[#allocation5 + $0xa8] sm:$0xff] }
  0x43   :  { %1232 = vmatprep.subr.bf16.mxu0 %v1231_v21  ;;  %1023 = vmatprep.mubr.msk.f32.mxu0 %vm1625_vm1, %v162_v32  ;;  %v155_v0 = vrot.slane %v1652_v56, 7  ;;  %v1255_v11 = vpack.c.bf16 %v141_v8, %v140_v7  ;;  %v1259_v18 = vpack.c.bf16 %v143_v15, %v142_v14  ;;  %v144_v19 = vld [vmem:[#allocation5 + $0xb0] sm:$0xff]  ;;  %v145_v20 = vld [vmem:[#allocation5 + $0xb8] sm:$0xff]  ;;  %v146_v24 = vld [vmem:[#allocation5 + $0xc0] sm:$0xff]  ;;  %v361_v47 = vrot.slane %v1620_v22, 1  ;;  %p1507_p0 = pnand %p1506_p13, %p1500_p10 }
  0x44   :  { %1320 = vmatprep.subr.bf16.mxu1 %v1319_v48  ;;  %v159_v17 = vsel %vm158_vm0, %v156_v6, %v157_v28  ;;  %v147_v25 = vld [vmem:[#allocation5 + $0xc8] sm:$0xff]  ;;  %v148_v29 = vld [vmem:[#allocation5 + $0xd0] sm:$0xff]  ;;  %v149_v30 = vld [vmem:[#allocation5 + $0xd8] sm:$0xff]  ;;  %v66_v3 = vadd.s32 8, %v1610_v1 }
  0x45   :  { %v161_v10 = vsel %vm158_vm0, %v154_v27, %v155_v0  ;;  %v160_v13 = vsel %vm158_vm0, %v155_v0, %v156_v6  ;;  %v1267_v27 = vpack.c.bf16 %v147_v25, %v146_v24  ;;  %v1271_v28 = vpack.c.bf16 %v149_v30, %v148_v29  ;;  %v151_v32 = vld [vmem:[#allocation5 + $0xe8] sm:$0xff]  ;;  %v152_v34 = vld [vmem:[#allocation5 + $0xf0] sm:$0xff]  ;;  %v153_v37 = vld [vmem:[#allocation5 + $0xf8] sm:$0xff] }
  0x46   :  { %1234 = vmatpush3.bf16.msra.mxu0 %v1231_v21  ;;  %1322 = vmatpush3.bf16.msra.mxu1 %v1319_v48  ;;  %v1263_v21 = vpack.c.bf16 %v145_v20, %v144_v19  ;;  %v383_v39 = vld [vmem:[#allocation5 + $0x100] sm:$0xff]  ;;  %v384_v40 = vld [vmem:[#allocation5 + $0x108] sm:$0xff]  ;;  %v385_v43 = vld [vmem:[#allocation5 + $0x110] sm:$0xff]  ;;  %v362_v48 = vrot.slane %v1652_v56, 1  ;;  %v80_v5 = vand.u32 15, %v66_v3  ;;  %v68_v6 = vadd.s32 24, %v1610_v1 }
  0x47   :  { %1236 = vmatprep.subr.bf16.mxu0 %v1235_v31  ;;  %1324 = vmatprep.subr.bf16.mxu1 %v1323_v55  ;;  %v1283_v42 = vpack.c.bf16 %v384_v40, %v383_v39  ;;  %v386_v44 = vld [vmem:[#allocation5 + $0x118] sm:$0xff]  ;;  %v387_v49 = vld [vmem:[#allocation5 + $0x120] sm:$0xff]  ;;  %v388_v50 = vld [vmem:[#allocation5 + $0x128] sm:$0xff] }
  0x48   :  { %v1287_v45 = vpack.c.bf16 %v386_v44, %v385_v43  ;;  %v1291_v51 = vpack.c.bf16 %v388_v50, %v387_v49  ;;  %v389_v53 = vld [vmem:[#allocation5 + $0x130] sm:$0xff]  ;;  %v390_v54 = vld [vmem:[#allocation5 + $0x138] sm:$0xff]  ;;  %v392_v57 = vld [vmem:[#allocation5 + $0x148] sm:$0xff]  ;;  %vm1683_vm4 = vcmp.lt.s32.totalorder %v80_v5, 15  ;;  %v367_v8 = vsel %vm365_vm2, %v362_v48, %v363_v41 }
  0x49   :  { %v393_v58 = vld [vmem:[#allocation5 + $0x150] sm:$0xff]  ;;  %v395_v61 = vld [vmem:[#allocation5 + $0x160] sm:$0xff]  ;;  %v396_v62 = vld [vmem:[#allocation5 + $0x168] sm:$0xff] }
  0x4a   :  { %1238 = vmatpush3.bf16.msra.mxu0 %v1235_v31  ;;  %1326 = vmatpush3.bf16.msra.mxu1 %v1323_v55  ;;  %v150_v31 = vld [vmem:[#allocation5 + $0xe0] sm:$0xff]  ;;  %v397_v0 = vld [vmem:[#allocation5 + $0x170] sm:$0xff]  ;;  %v398_v2 = vld [vmem:[#allocation5 + $0x178] sm:$0xff] }
  0x4b   :  { %1240 = vmatprep.subr.bf16.mxu0 %v1239_v38  ;;  %1328 = vmatprep.subr.bf16.mxu1 %v1327_v63  ;;  %v1275_v33 = vpack.c.bf16 %v151_v32, %v150_v31  ;;  %v391_v55 = vld [vmem:[#allocation5 + $0x140] sm:$0xff]  ;;  %v540_v41 = vld [vmem:[#allocation7 + $0x58] sm:$0xff]  ;;  %v542_v15 = vld [vmem:[#allocation7 + $0x68] sm:$0xff] }
  0x4c   :  { %v541_v14 = vld [vmem:[#allocation7 + $0x60] sm:$0xff]  ;;  %v510_v3 = vld [vmem:[#allocation7 + $0xc8] sm:$0xff]  ;;  %v511_v5 = vld [vmem:[#allocation7 + $0xd0] sm:$0xff] }
  0x4e   :  { %1242 = vmatpush3.bf16.msra.mxu0 %v1239_v38  ;;  %1330 = vmatpush3.bf16.msra.mxu1 %v1327_v63  ;;  %v1279_v38 = vpack.c.bf16 %v153_v37, %v152_v34  ;;  %v1307_v63 = vpack.c.bf16 %v396_v62, %v395_v61  ;;  %v507_v62 = vld [vmem:[#allocation7 + $0xb0] sm:$0xff] }
  0x4f   :  { %1244 = vmatprep.subr.bf16.mxu0 %v1243_v52  ;;  %1332 = vmatprep.subr.bf16.mxu1 %v1331_v9 }
  0x52   :  { %1246 = vmatpush3.bf16.msra.mxu0 %v1243_v52  ;;  %1334 = vmatpush3.bf16.msra.mxu1 %v1331_v9  ;;  %v368_v52 = vsel %vm365_vm2, %v361_v47, %v362_v48  ;;  %v94_v9 = vand.u32 15, %v68_v6  ;;  %v504_v48 = vld [vmem:[#allocation7 + $0x98] sm:$0xff] }
  0x53   :  { %1248 = vmatprep.subr.bf16.mxu0 %v1247_v59  ;;  %v512_v6 = vld [vmem:[#allocation7 + $0xd8] sm:$0xff] }
  0x54   :  { %vm1694_vm5 = vcmp.lt.s32.totalorder %v94_v9, 15  ;;  %v1367_v12 = vpack.c.bf16 %v512_v6, %v511_v5  ;;  %v514_v9 = vld [vmem:[#allocation7 + $0xe8] sm:$0xff] }
  0x56   :  { %1250 = vmatpush3.bf16.msra.mxu0 %v1247_v59  ;;  %v394_v59 = vld [vmem:[#allocation5 + $0x158] sm:$0xff] }
  0x57   :  { %1252 = vmatprep.subr.bf16.mxu0 %v1251_v4  ;;  %v1303_v60 = vpack.c.bf16 %v394_v59, %v393_v58  ;;  %v505_v58 = vld [vmem:[#allocation7 + $0xa0] sm:$0xff]  ;;  %v506_v59 = vld [vmem:[#allocation7 + $0xa8] sm:$0xff] }
  0x58   :  { %v1355_v26 = vpack.c.bf16 %v506_v59, %v505_v58 }
  0x59   :  { %1024 = vmatmul.mubr.f32.vlgmr.msra.gmra.mrb[0].mxu0 %v161_v10 }
  0x5a   :  { %1254 = vmatpush3.bf16.msra.mxu0 %v1251_v4  ;;  %1026 = vmatprep.mubr.msk.f32.mxu0 %vm1661_vm3, %v160_v13  ;;  %v1311_v4 = vpack.c.bf16 %v398_v2, %v397_v0  ;;  %v509_v2 = vld [vmem:[#allocation7 + $0xc0] sm:$0xff] }
  0x5b   :  { %1256 = vmatprep.subr.bf16.mxu0 %v1255_v11 }
  0x5d   :  { %1027 = vmatmul.mubr.f32.gmra.mrb[2].mxu0 %v159_v17  ;;  %v543_v17 = vld [vmem:[#allocation7 + $0x70] sm:$0xff] }
  0x5e   :  { %1258 = vmatpush3.bf16.msra.mxu0 %v1255_v11  ;;  %1061 = vmatprep.mubr.f32.mxu0 %v1620_v22  ;;  %v1295_v22 = vpack.c.bf16 %v390_v54, %v389_v53  ;;  %v369_v11 = vsel %vm365_vm2, %v364_v36, %v361_v47  ;;  %v502_v36 = vld [vmem:[#allocation7 + $0x88] sm:$0xff]  ;;  %v503_v47 = vld [vmem:[#allocation7 + $0x90] sm:$0xff] }
  0x5f   :  { %1260 = vmatprep.subr.bf16.mxu0 %v1259_v18 }
  0x62   :  { %1262 = vmatpush3.bf16.msra.mxu0 %v1259_v18  ;;  %v544_v18 = vld [vmem:[#allocation7 + $0x78] sm:$0xff] }
  0x63   :  { %1264 = vmatprep.subr.bf16.mxu0 %v1263_v21  ;;  %v1343_v19 = vpack.c.bf16 %v544_v18, %v543_v17  ;;  %v730_v17 = vld [vmem:[#allocation7 + $0x110] sm:$0xff]  ;;  %v731_v18 = vld [vmem:[#allocation7 + $0x118] sm:$0xff] }
  0x66   :  { %1266 = vmatpush3.bf16.msra.mxu0 %v1263_v21  ;;  %v490_v21 = vsub.s32 1, %v1610_v1 }
  0x67   :  { %1268 = vmatprep.subr.bf16.mxu0 %v1267_v27 }
  0x68   :  { %v491_v24 = vrot.slane %v1616_v16, %v490_v21  ;;  %v734_v21 = vld [vmem:[#allocation7 + $0x130] sm:$0xff] }
  0x6a   :  { %1270 = vmatpush3.bf16.msra.mxu0 %v1267_v27 }
  0x6b   :  { %1272 = vmatprep.subr.bf16.mxu0 %v1271_v28 }
  0x6e   :  { %1274 = vmatpush3.bf16.msra.mxu0 %v1271_v28 }
  0x6f   :  { %1276 = vmatprep.subr.bf16.mxu0 %v1275_v33 }
  0x72   :  { %1278 = vmatpush3.bf16.msra.mxu0 %v1275_v33 }
  0x73   :  { %1280 = vmatprep.subr.bf16.mxu0 %v1279_v38 }
  0x76   :  { %1282 = vmatpush3.bf16.msra.mxu0 %v1279_v38 }
  0x77   :  { %1284 = vmatprep.subr.bf16.mxu0 %v1283_v42 }
  0x79   :  { %1062 = vmatmul.mubr.f32.vlgmr.msra.gmra.mrb[0].mxu0 %v1652_v56  ;;  %v1299_v56 = vpack.c.bf16 %v392_v57, %v391_v55 }
  0x7a   :  { %1286 = vmatpush3.bf16.msra.mxu0 %v1283_v42  ;;  %1064 = vmatprep.mubr.f32.mxu0 %v1639_v35  ;;  %v539_v35 = vld [vmem:[#allocation7 + $0x50] sm:$0xff] }
  0x7b   :  { %1288 = vmatprep.subr.bf16.mxu0 %v1287_v45  ;;  %v1335_v13 = vpack.c.bf16 %v540_v41, %v539_v35  ;;  %v515_v35 = vld [vmem:[#allocation7 + $0xf0] sm:$0xff]  ;;  %v516_v41 = vld [vmem:[#allocation7 + $0xf8] sm:$0xff] }
  0x7d   :  { %1065 = vmatmul.mubr.f32.gmra.mrb[2].mxu0 %v1622_v23  ;;  %1336 = vmatprep.subr.bf16.mxu1 %v1335_v13  ;;  %v501_v23 = vld [vmem:[#allocation7 + $0x80] sm:$0xff] }
  0x7e   :  { %1290 = vmatpush3.bf16.msra.mxu0 %v1287_v45  ;;  %1099 = vmatprep.mubr.f32.mxu0 %v368_v52  ;;  %v1347_v20 = vpack.c.bf16 %v502_v36, %v501_v23  ;;  %v732_v23 = vld [vmem:[#allocation7 + $0x120] sm:$0xff]  ;;  %v733_v36 = vld [vmem:[#allocation7 + $0x128] sm:$0xff] }
  0x7f   :  { %1292 = vmatprep.subr.bf16.mxu0 %v1291_v51  ;;  %1338 = vmatpush3.bf16.msra.mxu1 %v1335_v13  ;;  %v1375_v13 = vpack.c.bf16 %v516_v41, %v515_v35 }
  0x82   :  { %1294 = vmatpush3.bf16.msra.mxu0 %v1291_v51 }
  0x83   :  { %1296 = vmatprep.subr.bf16.mxu0 %v1295_v22 }
  0x86   :  { %1298 = vmatpush3.bf16.msra.mxu0 %v1295_v22  ;;  %v1351_v22 = vpack.c.bf16 %v504_v48, %v503_v47 }
  0x87   :  { %1300 = vmatprep.subr.bf16.mxu0 %v1299_v56 }
  0x8a   :  { %1302 = vmatpush3.bf16.msra.mxu0 %v1299_v56 }
  0x8b   :  { %1304 = vmatprep.subr.bf16.mxu0 %v1303_v60 }
  0x8e   :  { %1306 = vmatpush3.bf16.msra.mxu0 %v1303_v60 }
  0x8f   :  { %1308 = vmatprep.subr.bf16.mxu0 %v1307_v63 }
  0x92   :  { %1310 = vmatpush3.bf16.msra.mxu0 %v1307_v63  ;;  %v508_v63 = vld [vmem:[#allocation7 + $0xb8] sm:$0xff] }
  0x93   :  { %1312 = vmatprep.subr.bf16.mxu0 %v1311_v4  ;;  %v1359_v0 = vpack.c.bf16 %v508_v63, %v507_v62 }
  0x96   :  { %1314 = vmatpush3.bf16.msra.mxu0 %v1311_v4  ;;  %v1363_v4 = vpack.c.bf16 %v510_v3, %v509_v2 }
  0x99   :  { %1100 = vmatmul.mubr.msk.f32.vlgmr.msra.gmra.mrb[0].mxu0 %vm1683_vm4, %v367_v8  ;;  %v513_v8 = vld [vmem:[#allocation7 + $0xe0] sm:$0xff] }
  0x9a   :  { %1102 = vmatprep.mubr.f32.mxu0 %v1650_v46  ;;  %v1339_v46 = vpack.c.bf16 %v542_v15, %v541_v14  ;;  %v728_v14 = vld [vmem:[#allocation7 + $0x100] sm:$0xff]  ;;  %v729_v15 = vld [vmem:[#allocation7 + $0x108] sm:$0xff] }
  0x9c   :  { %1340 = vmatprep.subr.bf16.mxu1 %v1339_v46 }
  0x9d   :  { %1103 = vmatmul.mubr.msk.f32.gmra.mrb[2].mxu0 %vm1694_vm5, %v369_v11  ;;  %1342 = vmatpush3.bf16.msra.mxu1 %v1339_v46  ;;  %v1371_v11 = vpack.c.bf16 %v514_v9, %v513_v8  ;;  %v1379_v46 = vpack.c.bf16 %v729_v15, %v728_v14 }
  0x9e   :  { %1344 = vmatprep.subr.bf16.mxu1 %v1343_v19 }
  0xa1   :  { %1346 = vmatpush3.bf16.msra.mxu1 %v1343_v19  ;;  %v1383_v19 = vpack.c.bf16 %v731_v18, %v730_v17 }
  0xa2   :  { %1348 = vmatprep.subr.bf16.mxu1 %v1347_v20 }
 0x16c   :  { %v1101_v25 = vpop.f32.mrb[0].mxu0 }
 0x16d   :  { %v493_v27 = vadd.f32 %v1101_v25, %v491_v24  ;;  %v465_v29 = vpop.f32.mrb[1].mxu0 }
 0x16e   :  { %v492_v30 = vadd.f32 %v491_v24, %v465_v29  ;;  %v737_v29 = vld [vmem:[#allocation7 + $0x148] sm:$0xff] }
 0x16f   :  { %v1706_v28 = vmax.f32 %v493_v27, 0.0  ;;  %v736_v27 = vld [vmem:[#allocation7 + $0x140] sm:$0xff] }
 0x170   :  { %v496_v31 = vmax.f32 %v492_v30, 0.0  ;;  %v1104_v32 = vpop.f32.mrb[2].mxu0  ;;  %v1395_v30 = vpack.c.bf16 %v737_v29, %v736_v27 }
 0x171   :  { %v518_v33 = vrot.slane %v1706_v28, 7  ;;  %v716_v34 = vrot.slane %v1706_v28, 1  ;;  %v495_v37 = vadd.f32 %v1104_v32, %v491_v24  ;;  %v475_v38 = vpop.f32.mrb[3].mxu0 }
 0x172   :  { %v715_v39 = vrot.slane %v496_v31, 1  ;;  %v494_v40 = vadd.f32 %v491_v24, %v475_v38  ;;  %v517_v42 = vrot.slane %v496_v31, 7  ;;  %v735_v24 = vld [vmem:[#allocation7 + $0x138] sm:$0xff]  ;;  %v742_v38 = vld [vmem:[#allocation7 + $0x170] sm:$0xff] }
 0x173   :  { %v1710_v43 = vmax.f32 %v495_v37, 0.0  ;;  %v1391_v25 = vpack.c.bf16 %v735_v24, %v734_v21 }
 0x174   :  { %v1712_v44 = vmax.f32 %v494_v40, 0.0  ;;  %v523_v45 = vsel %vm158_vm0, %v517_v42, %v518_v33  ;;  %v1718_v49 = vsel %vm365_vm2, %v715_v39, %v716_v34 }
 0x175   :  { %v718_v50 = vrot.slane %v1710_v43, 1  ;;  %v520_v51 = vrot.slane %v1710_v43, 7 }
 0x176   :  { %v519_v52 = vrot.slane %v1712_v44, 7  ;;  %v717_v53 = vrot.slane %v1712_v44, 1 }
 0x177   :  { %v524_v54 = vsel %vm158_vm0, %v520_v51, %v517_v42  ;;  %v1728_v55 = vsel %vm365_vm2, %v718_v50, %v715_v39  ;;  %v743_v39 = vld [vmem:[#allocation7 + $0x178] sm:$0xff]  ;;  %v835_v42 = vsub.s32 2, %v1610_v1 }
 0x178   :  { %1137 = vmatprep.mubr.msk.f32.mxu1 %vm1625_vm1, %v524_v54  ;;  %v522_v57 = vsel %vm158_vm0, %v518_v33, %v519_v52  ;;  %v521_v56 = vsel %vm158_vm0, %v519_v52, %v520_v51  ;;  %v1738_v60 = vsel %vm365_vm2, %v716_v34, %v717_v53  ;;  %v1742_v61 = vsel %vm365_vm2, %v717_v53, %v718_v50  ;;  %v740_v33 = vld [vmem:[#allocation7 + $0x160] sm:$0xff]  ;;  %v741_v34 = vld [vmem:[#allocation7 + $0x168] sm:$0xff] }
 0x179   :  { %1138 = vmatmul.mubr.f32.vlgmr.msra.gmra.mrb[0].mxu1 %v523_v45  ;;  %v1403_v37 = vpack.c.bf16 %v741_v34, %v740_v33  ;;  %v1407_v40 = vpack.c.bf16 %v743_v39, %v742_v38 }
 0x17a   :  { %1350 = vmatpush3.bf16.msra.mxu1 %v1347_v20  ;;  %1140 = vmatprep.mubr.msk.f32.mxu1 %vm1661_vm3, %v522_v57  ;;  %v1387_v20 = vpack.c.bf16 %v733_v36, %v732_v23 }
 0x17b   :  { %1352 = vmatprep.subr.bf16.mxu1 %v1351_v22 }
 0x17d   :  { %1141 = vmatmul.mubr.f32.gmra.mrb[2].mxu1 %v521_v56 }
 0x17e   :  { %1354 = vmatpush3.bf16.msra.mxu1 %v1351_v22  ;;  %1175 = vmatprep.mubr.f32.mxu1 %v496_v31  ;;  %v739_v31 = vld [vmem:[#allocation7 + $0x158] sm:$0xff] }
 0x17f   :  { %1356 = vmatprep.subr.bf16.mxu1 %v1355_v26 }
 0x182   :  { %1358 = vmatpush3.bf16.msra.mxu1 %v1355_v26 }
 0x183   :  { %1360 = vmatprep.subr.bf16.mxu1 %v1359_v0 }
 0x186   :  { %1362 = vmatpush3.bf16.msra.mxu1 %v1359_v0 }
 0x187   :  { %1364 = vmatprep.subr.bf16.mxu1 %v1363_v4 }
 0x18a   :  { %1366 = vmatpush3.bf16.msra.mxu1 %v1363_v4 }
 0x18b   :  { %1368 = vmatprep.subr.bf16.mxu1 %v1367_v12 }
 0x18e   :  { %1370 = vmatpush3.bf16.msra.mxu1 %v1367_v12 }
 0x18f   :  { %1372 = vmatprep.subr.bf16.mxu1 %v1371_v11 }
 0x192   :  { %1374 = vmatpush3.bf16.msra.mxu1 %v1371_v11 }
 0x193   :  { %1376 = vmatprep.subr.bf16.mxu1 %v1375_v13 }
 0x196   :  { %1378 = vmatpush3.bf16.msra.mxu1 %v1375_v13 }
 0x197   :  { %1380 = vmatprep.subr.bf16.mxu1 %v1379_v46 }
 0x199   :  { %1176 = vmatmul.mubr.f32.vlgmr.msra.gmra.mrb[0].mxu1 %v1706_v28  ;;  %v738_v28 = vld [vmem:[#allocation7 + $0x150] sm:$0xff] }
 0x19a   :  { %1178 = vmatprep.mubr.f32.mxu1 %v1712_v44  ;;  %1382 = vmatpush3.bf16.msra.mxu1 %v1379_v46  ;;  %v1399_v32 = vpack.c.bf16 %v739_v31, %v738_v28 }
 0x19b   :  { %1384 = vmatprep.subr.bf16.mxu1 %v1383_v19 }
 0x19d   :  { %1179 = vmatmul.mubr.f32.gmra.mrb[2].mxu1 %v1710_v43  ;;  %v836_v43 = vrot.slane %v1616_v16, %v835_v42 }
 0x19e   :  { %1386 = vmatpush3.bf16.msra.mxu1 %v1383_v19  ;;  %1213 = vmatprep.mubr.f32.mxu1 %v1718_v49 }
 0x19f   :  { %1388 = vmatprep.subr.bf16.mxu1 %v1387_v20 }
 0x1a2   :  { %1390 = vmatpush3.bf16.msra.mxu1 %v1387_v20 }
 0x1a3   :  { %1392 = vmatprep.subr.bf16.mxu1 %v1391_v25 }
 0x1a6   :  { %1394 = vmatpush3.bf16.msra.mxu1 %v1391_v25 }
 0x1a7   :  { %1396 = vmatprep.subr.bf16.mxu1 %v1395_v30 }
 0x1aa   :  { %1398 = vmatpush3.bf16.msra.mxu1 %v1395_v30 }
 0x1ab   :  { %1400 = vmatprep.subr.bf16.mxu1 %v1399_v32 }
 0x1ae   :  { %1402 = vmatpush3.bf16.msra.mxu1 %v1399_v32 }
 0x1af   :  { %1404 = vmatprep.subr.bf16.mxu1 %v1403_v37 }
 0x1b2   :  { %1406 = vmatpush3.bf16.msra.mxu1 %v1403_v37 }
 0x1b3   :  { %1408 = vmatprep.subr.bf16.mxu1 %v1407_v40 }
 0x1b6   :  { %1410 = vmatpush3.bf16.msra.mxu1 %v1407_v40 }
 0x1b9   :  { %1214 = vmatmul.mubr.msk.f32.vlgmr.msra.gmra.mrb[0].mxu1 %vm1683_vm4, %v1738_v60 }
 0x1ba   :  { %1216 = vmatprep.mubr.f32.mxu1 %v1742_v61 }
 0x1bd   :  { %1217 = vmatmul.mubr.msk.f32.gmra.mrb[2].mxu1 %vm1694_vm5, %v1728_v55 }
 0x28c   :  { %v1215_v44 = vpop.f32.mrb[0].mxu1 }
 0x28d   :  { %v838_v45 = vadd.f32 %v1215_v44, %v836_v43  ;;  %v810_v47 = vpop.f32.mrb[1].mxu1 }
 0x28e   :  { %v837_v48 = vadd.f32 %v836_v43, %v810_v47 }
 0x28f   :  { %842 = vst [vmem:[#allocation8 + $0x8] sm:$0xff] %v838_v45 }
 0x290   :  { %841 = vst [vmem:[#allocation8] sm:$0xff] %v837_v48  ;;  %v1218_v7 = vpop.f32.mrb[2].mxu1 }
 0x291   :  { %v840_v49 = vadd.f32 %v1218_v7, %v836_v43  ;;  %v820_v50 = vpop.f32.mrb[3].mxu1 }
 0x292   :  { %v839_v51 = vadd.f32 %v836_v43, %v820_v50 }
 0x293   :  { %844 = vst [vmem:[#allocation8 + $0x18] sm:$0xff] %v840_v49 }
 0x294   :  { %843 = vst [vmem:[#allocation8 + $0x10] sm:$0xff] %v839_v51 }
 0x295   :  { %1510 = shalt.err (!%p1507_p0)
}
 0x296   :  { %s1511_s6 = scalar_lea.hbm %s1778_s4, 512 }
 0x297   :  { %p1512_p1 = scmp.ne.s32.totalorder %s1778_s4, %s1511_s6  ;;  %p1515_p2 = scmp.lt.u32.totalorder %s1511_s6, %s1778_s4 }
 0x299   :  { %p1517_p3 = pnand %p1515_p2, %p1512_p1 }
 0x29b   :  { %1520 = shalt.err (!%p1517_p3)
}
 0x29c   :  { %856 = dma.vmem_to_hbm [thread:$0]  %s851_s26, 512, %s1778_s4, [#allocation4], %s1529_s27, %s1529_s27, %s1530_s28  }
 0x29d   :  { %1525 = dma.done.wait [#allocation4], 512  }
 0x29e   :  { %1526 = vsyncadd [#allocation4], 4294966784 }
 0x29f   :  { %860 = vsyncpa [#allocation3], 1 }
 0x2a0   :  { %861 = vsyncpa [#allocation6], 1 }
 0x2a1   :  { %862 = vsyncpa [#allocation4], 1 }

</bundles_post_ra>
